<compile_context>
chip_gen: v7x
topology: tpu7x:2x2x1
jax: 0.10.0
libtpu: 0.0.40
codegen_flags: <defaults>
</compile_context>

<pallas_src>
import functools

import jax
import jax.numpy as jnp
from jax.experimental import pallas as pl
from jax.experimental.pallas import tpu as pltpu

FEAT = 28 * 28
TILE_B_MAX = 1024      # cap per-step batch tile (fits v5e/v6e/v7x VMEM budgets)
LANE = 128


def _cdiv(a, b):
    return -(-a // b)


def _round_up(a, m):
    return _cdiv(a, m) * m


def autoencoder_kernel(
    bias_slices,                                   # static ((off, width) x 8)
    x_ref,
    w1_ref, w2_ref, w3_ref, w4_ref,                # encoder weights (in, out)
    w5_ref, w6_ref, w7_ref, w8_ref,                # decoder weights (in, out)
    b_ref,                                         # (1, total) concatenated biases
    o_ref,
):
    def linear(h, w_ref, idx):
        off, width = bias_slices[idx]
        # bf16 MXU operands, f32 accumulation, f32 bias add (single VPU add).
        y = jnp.dot(
            h.astype(jnp.bfloat16), w_ref[...],
            preferred_element_type=jnp.float32,
        )
        return y + b_ref[:, off:off + width]       # static, lane-aligned slice

    x = x_ref[...].astype(jnp.float32)

    # Encoder: Linear->ReLU x3, then Linear to latent.
    h = jnp.maximum(linear(x, w1_ref, 0), 0.0)
    h = jnp.maximum(linear(h, w2_ref, 1), 0.0)
    h = jnp.maximum(linear(h, w3_ref, 2), 0.0)
    z = linear(h, w4_ref, 3)

    # Decoder: Linear->ReLU x3, then Linear->Tanh.
    h = jnp.maximum(linear(z, w5_ref, 4), 0.0)
    h = jnp.maximum(linear(h, w6_ref, 5), 0.0)
    h = jnp.maximum(linear(h, w7_ref, 6), 0.0)
    y = jnp.tanh(linear(h, w8_ref, 7))

    o_ref[...] = y.astype(o_ref.dtype)


@jax.jit
def autoencoder_forward(x_nchw, params):
    B = x_nchw.shape[0]
    x_flat = x_nchw.reshape(B, FEAT).astype(jnp.float32)   # x.view(x.size(0), -1)

    # ---- adaptive batch tiling ------------------------------------------
    grid = max(1, _cdiv(B, TILE_B_MAX))
    if B >= 16:
        grid = max(grid, 2)        # let "parallel" shard across v7x's 2 TCs
    tb = _round_up(_cdiv(B, grid), 8)
    Bp = grid * tb                 # padding is at most 7 * grid rows
    if Bp != B:
        x_flat = jnp.pad(x_flat, ((0, Bp - B), (0, 0)))

    # ---- pack parameters: bf16 weights, one concatenated f32 bias buffer --
    weights = []
    bias_chunks = []
    bias_slices = []
    off = 0
    for (w, b) in params:
        weights.append(w.astype(jnp.bfloat16))
        out = w.shape[1]
        width = _round_up(out, LANE)               # lane-aligned slice starts
        bias_slices.append((off, out))
        bias_chunks.append(jnp.pad(b.astype(jnp.float32), (0, width - out)))
        off += width
    bias_all = jnp.concatenate(bias_chunks).reshape(1, off)

    in_specs = [pl.BlockSpec((tb, FEAT), lambda i: (i, 0))]
    in_specs += [pl.BlockSpec(w.shape, lambda i: (0, 0)) for w in weights]
    in_specs += [pl.BlockSpec(bias_all.shape, lambda i: (0, 0))]

    dims = [(w.shape[0], w.shape[1]) for (w, _) in params]
    flops = 2 * Bp * sum(fi * fo for fi, fo in dims)
    bytes_accessed = (
        Bp * FEAT * 4 * 2                                  # x in + out (f32)
        + sum(fi * fo * 2 for fi, fo in dims)              # bf16 weights
        + bias_all.size * 4                                # packed f32 biases
    )

    kernel = functools.partial(autoencoder_kernel, tuple(bias_slices))

    out_flat = pl.pallas_call(
        kernel,
        out_shape=jax.ShapeDtypeStruct((Bp, FEAT), jnp.float32),
        grid_spec=pltpu.PrefetchScalarGridSpec(
            num_scalar_prefetch=0,
            grid=(grid,),
            in_specs=in_specs,
            out_specs=pl.BlockSpec((tb, FEAT), lambda i: (i, 0)),
        ),
        compiler_params=pltpu.CompilerParams(
            dimension_semantics=("parallel",),
            vmem_limit_bytes=48 * 1024 * 1024,
        ),
        cost_estimate=pl.CostEstimate(
            flops=flops,
            transcendentals=Bp * FEAT,      # tanh on the output layer
            bytes_accessed=bytes_accessed,
        ),
    )(x_flat, *weights, bias_all)

    if Bp != B:
        out_flat = out_flat[:B]
    return out_flat.reshape(B, 1, 28, 28)       # x.view(x.size(0), 1, 28, 28)


def autoencoder_reference(x_nchw, params):
    """Pure-JAX f32 reference of the PyTorch forward (for validation)."""
    B = x_nchw.shape[0]
    h = x_nchw.reshape(B, FEAT).astype(jnp.float32)
    for li, (w, b) in enumerate(params):
        h = h @ w + b
        if li in (0, 1, 2, 4, 5, 6):
            h = jnp.maximum(h, 0.0)
        elif li == 7:
            h = jnp.tanh(h)
    return h.reshape(B, 1, 28, 28)


def init_params(key, dim_latent):
    """nn.Linear-style init (uniform +/- 1/sqrt(fan_in)); W stored (in, out)."""
    dims = [
        (FEAT, 128), (128, 64), (64, 12), (12, dim_latent),      # encoder
        (dim_latent, 12), (12, 64), (64, 128), (128, FEAT),      # decoder
    ]
    params = []
    for (fan_in, fan_out) in dims:
        key, kw, kb = jax.random.split(key, 3)
        bound = 1.0 / (fan_in ** 0.5)
        w = jax.random.uniform(
            kw, (fan_in, fan_out), jnp.float32, minval=-bound, maxval=bound
        )
        b = jax.random.uniform(
            kb, (fan_out,), jnp.float32, minval=-bound, maxval=bound
        )
        params.append((w, b))
    return params


if __name__ == "__main__":
    dim_latent = 3
    batch = 2

    key = jax.random.PRNGKey(0)
    key, kx = jax.random.split(key)
    x = jax.random.normal(kx, (batch, 1, 28, 28), jnp.float32)  # NCHW

    params = init_params(key, dim_latent)

    out = autoencoder_forward(x, params)
    out = jax.block_until_ready(out)

    assert out.shape == (batch, 1, 28, 28), out.shape
    assert out.dtype == jnp.float32, out.dtype

    # bf16 MXU operands (f32 accumulation) -> allow a generous tolerance.
    ref = autoencoder_reference(x, params)
    assert jnp.all(jnp.abs(out - ref) < 5e-2), float(jnp.max(jnp.abs(out - ref)))

    print("KERNEL_OK")
</pallas_src>

<mosaic_0001>
module attributes {stable_mosaic.version = 11 : i64} {
  func.func @autoencoder_kernel(%arg0: i32, %arg1: memref<8x784xf32, #tpu.memory_space<vmem>>, %arg2: memref<784x128xbf16, #tpu.memory_space<vmem>>, %arg3: memref<128x64xbf16, #tpu.memory_space<vmem>>, %arg4: memref<64x12xbf16, #tpu.memory_space<vmem>>, %arg5: memref<12x3xbf16, #tpu.memory_space<vmem>>, %arg6: memref<3x12xbf16, #tpu.memory_space<vmem>>, %arg7: memref<12x64xbf16, #tpu.memory_space<vmem>>, %arg8: memref<64x128xbf16, #tpu.memory_space<vmem>>, %arg9: memref<128x784xbf16, #tpu.memory_space<vmem>>, %arg10: memref<1x1792xf32, #tpu.memory_space<vmem>>, %arg11: memref<8x784xf32, #tpu.memory_space<vmem>>) attributes {dimension_semantics = [#tpu.dimension_semantics<parallel>], iteration_bounds = array<i64: 1>, scalar_prefetch = 0 : i64, scratch_operands = 0 : i64, tpu.core_type = #tpu.core_type<tc>, window_params = [{transform_indices = @transform_0, window_bounds = array<i64: 8, 784>}, {pipeline_mode = #tpu.pipeline_mode<synchronous>, transform_indices = @transform_1, window_bounds = array<i64: 784, 128>}, {pipeline_mode = #tpu.pipeline_mode<synchronous>, transform_indices = @transform_2, window_bounds = array<i64: 128, 64>}, {pipeline_mode = #tpu.pipeline_mode<synchronous>, transform_indices = @transform_3, window_bounds = array<i64: 64, 12>}, {pipeline_mode = #tpu.pipeline_mode<synchronous>, transform_indices = @transform_4, window_bounds = array<i64: 12, 3>}, {pipeline_mode = #tpu.pipeline_mode<synchronous>, transform_indices = @transform_5, window_bounds = array<i64: 3, 12>}, {pipeline_mode = #tpu.pipeline_mode<synchronous>, transform_indices = @transform_6, window_bounds = array<i64: 12, 64>}, {pipeline_mode = #tpu.pipeline_mode<synchronous>, transform_indices = @transform_7, window_bounds = array<i64: 64, 128>}, {pipeline_mode = #tpu.pipeline_mode<synchronous>, transform_indices = @transform_8, window_bounds = array<i64: 128, 784>}, {pipeline_mode = #tpu.pipeline_mode<synchronous>, transform_indices = @transform_9, window_bounds = array<i64: 1, 1792>}, {transform_indices = @transform_10, window_bounds = array<i64: 8, 784>}]} {
    %c0 = arith.constant 0 : index
    %c0_0 = arith.constant 0 : index
    %0 = vector.load %arg1[%c0, %c0_0] : memref<8x784xf32, #tpu.memory_space<vmem>>, vector<8x784xf32>
    %1 = arith.truncf %0 : vector<8x784xf32> to vector<8x784xbf16>
    %c0_1 = arith.constant 0 : index
    %c0_2 = arith.constant 0 : index
    %2 = vector.load %arg2[%c0_1, %c0_2] : memref<784x128xbf16, #tpu.memory_space<vmem>>, vector<784x128xbf16>
    %cst = arith.constant dense<0.000000e+00> : vector<8x128xf32>
    %3 = tpu.matmul %1, %2, %cst {dimension_numbers = #tpu.dot_dimension_numbers<[1], [0], [0], [1], [0, 0, 1, 1], [], []>} : vector<8x784xbf16>, vector<784x128xbf16>, vector<8x128xf32> -> vector<8x128xf32>
    %c0_3 = arith.constant 0 : index
    %c0_4 = arith.constant 0 : index
    %4 = vector.load %arg10[%c0_3, %c0_4] : memref<1x1792xf32, #tpu.memory_space<vmem>>, vector<1x128xf32>
    %5 = vector.broadcast %4 : vector<1x128xf32> to vector<8x128xf32>
    %6 = arith.addf %3, %5 : vector<8x128xf32>
    %cst_5 = arith.constant 0.000000e+00 : f32
    %7 = vector.broadcast %cst_5 : f32 to vector<8x128xf32>
    %8 = arith.maximumf %6, %7 : vector<8x128xf32>
    %9 = arith.truncf %8 : vector<8x128xf32> to vector<8x128xbf16>
    %c0_6 = arith.constant 0 : index
    %c0_7 = arith.constant 0 : index
    %10 = vector.load %arg3[%c0_6, %c0_7] : memref<128x64xbf16, #tpu.memory_space<vmem>>, vector<128x64xbf16>
    %cst_8 = arith.constant dense<0.000000e+00> : vector<8x64xf32>
    %11 = tpu.matmul %9, %10, %cst_8 {dimension_numbers = #tpu.dot_dimension_numbers<[1], [0], [0], [1], [0, 0, 1, 1], [], []>} : vector<8x128xbf16>, vector<128x64xbf16>, vector<8x64xf32> -> vector<8x64xf32>
    %c0_9 = arith.constant 0 : index
    %c128 = arith.constant 128 : index
    %12 = vector.load %arg10[%c0_9, %c128] : memref<1x1792xf32, #tpu.memory_space<vmem>>, vector<1x64xf32>
    %13 = vector.broadcast %12 : vector<1x64xf32> to vector<8x64xf32>
    %14 = arith.addf %11, %13 : vector<8x64xf32>
    %cst_10 = arith.constant 0.000000e+00 : f32
    %15 = vector.broadcast %cst_10 : f32 to vector<8x64xf32>
    %16 = arith.maximumf %14, %15 : vector<8x64xf32>
    %17 = arith.truncf %16 : vector<8x64xf32> to vector<8x64xbf16>
    %c0_11 = arith.constant 0 : index
    %c0_12 = arith.constant 0 : index
    %18 = vector.load %arg4[%c0_11, %c0_12] : memref<64x12xbf16, #tpu.memory_space<vmem>>, vector<64x12xbf16>
    %cst_13 = arith.constant dense<0.000000e+00> : vector<8x12xf32>
    %19 = tpu.matmul %17, %18, %cst_13 {dimension_numbers = #tpu.dot_dimension_numbers<[1], [0], [0], [1], [0, 0, 1, 1], [], []>} : vector<8x64xbf16>, vector<64x12xbf16>, vector<8x12xf32> -> vector<8x12xf32>
    %c0_14 = arith.constant 0 : index
    %c256 = arith.constant 256 : index
    %20 = vector.load %arg10[%c0_14, %c256] : memref<1x1792xf32, #tpu.memory_space<vmem>>, vector<1x12xf32>
    %21 = vector.broadcast %20 : vector<1x12xf32> to vector<8x12xf32>
    %22 = arith.addf %19, %21 : vector<8x12xf32>
    %cst_15 = arith.constant 0.000000e+00 : f32
    %23 = vector.broadcast %cst_15 : f32 to vector<8x12xf32>
    %24 = arith.maximumf %22, %23 : vector<8x12xf32>
    %25 = arith.truncf %24 : vector<8x12xf32> to vector<8x12xbf16>
    %c0_16 = arith.constant 0 : index
    %c0_17 = arith.constant 0 : index
    %26 = vector.load %arg5[%c0_16, %c0_17] : memref<12x3xbf16, #tpu.memory_space<vmem>>, vector<12x3xbf16>
    %cst_18 = arith.constant dense<0.000000e+00> : vector<8x3xf32>
    %27 = tpu.matmul %25, %26, %cst_18 {dimension_numbers = #tpu.dot_dimension_numbers<[1], [0], [0], [1], [0, 0, 1, 1], [], []>} : vector<8x12xbf16>, vector<12x3xbf16>, vector<8x3xf32> -> vector<8x3xf32>
    %c0_19 = arith.constant 0 : index
    %c384 = arith.constant 384 : index
    %28 = vector.load %arg10[%c0_19, %c384] : memref<1x1792xf32, #tpu.memory_space<vmem>>, vector<1x3xf32>
    %29 = vector.broadcast %28 : vector<1x3xf32> to vector<8x3xf32>
    %30 = arith.addf %27, %29 : vector<8x3xf32>
    %31 = arith.truncf %30 : vector<8x3xf32> to vector<8x3xbf16>
    %c0_20 = arith.constant 0 : index
    %c0_21 = arith.constant 0 : index
    %32 = vector.load %arg6[%c0_20, %c0_21] : memref<3x12xbf16, #tpu.memory_space<vmem>>, vector<3x12xbf16>
    %cst_22 = arith.constant dense<0.000000e+00> : vector<8x12xf32>
    %33 = tpu.matmul %31, %32, %cst_22 {dimension_numbers = #tpu.dot_dimension_numbers<[1], [0], [0], [1], [0, 0, 1, 1], [], []>} : vector<8x3xbf16>, vector<3x12xbf16>, vector<8x12xf32> -> vector<8x12xf32>
    %c0_23 = arith.constant 0 : index
    %c512 = arith.constant 512 : index
    %34 = vector.load %arg10[%c0_23, %c512] : memref<1x1792xf32, #tpu.memory_space<vmem>>, vector<1x12xf32>
    %35 = vector.broadcast %34 : vector<1x12xf32> to vector<8x12xf32>
    %36 = arith.addf %33, %35 : vector<8x12xf32>
    %cst_24 = arith.constant 0.000000e+00 : f32
    %37 = vector.broadcast %cst_24 : f32 to vector<8x12xf32>
    %38 = arith.maximumf %36, %37 : vector<8x12xf32>
    %39 = arith.truncf %38 : vector<8x12xf32> to vector<8x12xbf16>
    %c0_25 = arith.constant 0 : index
    %c0_26 = arith.constant 0 : index
    %40 = vector.load %arg7[%c0_25, %c0_26] : memref<12x64xbf16, #tpu.memory_space<vmem>>, vector<12x64xbf16>
    %cst_27 = arith.constant dense<0.000000e+00> : vector<8x64xf32>
    %41 = tpu.matmul %39, %40, %cst_27 {dimension_numbers = #tpu.dot_dimension_numbers<[1], [0], [0], [1], [0, 0, 1, 1], [], []>} : vector<8x12xbf16>, vector<12x64xbf16>, vector<8x64xf32> -> vector<8x64xf32>
    %c0_28 = arith.constant 0 : index
    %c640 = arith.constant 640 : index
    %42 = vector.load %arg10[%c0_28, %c640] : memref<1x1792xf32, #tpu.memory_space<vmem>>, vector<1x64xf32>
    %43 = vector.broadcast %42 : vector<1x64xf32> to vector<8x64xf32>
    %44 = arith.addf %41, %43 : vector<8x64xf32>
    %cst_29 = arith.constant 0.000000e+00 : f32
    %45 = vector.broadcast %cst_29 : f32 to vector<8x64xf32>
    %46 = arith.maximumf %44, %45 : vector<8x64xf32>
    %47 = arith.truncf %46 : vector<8x64xf32> to vector<8x64xbf16>
    %c0_30 = arith.constant 0 : index
    %c0_31 = arith.constant 0 : index
    %48 = vector.load %arg8[%c0_30, %c0_31] : memref<64x128xbf16, #tpu.memory_space<vmem>>, vector<64x128xbf16>
    %cst_32 = arith.constant dense<0.000000e+00> : vector<8x128xf32>
    %49 = tpu.matmul %47, %48, %cst_32 {dimension_numbers = #tpu.dot_dimension_numbers<[1], [0], [0], [1], [0, 0, 1, 1], [], []>} : vector<8x64xbf16>, vector<64x128xbf16>, vector<8x128xf32> -> vector<8x128xf32>
    %c0_33 = arith.constant 0 : index
    %c768 = arith.constant 768 : index
    %50 = vector.load %arg10[%c0_33, %c768] : memref<1x1792xf32, #tpu.memory_space<vmem>>, vector<1x128xf32>
    %51 = vector.broadcast %50 : vector<1x128xf32> to vector<8x128xf32>
    %52 = arith.addf %49, %51 : vector<8x128xf32>
    %cst_34 = arith.constant 0.000000e+00 : f32
    %53 = vector.broadcast %cst_34 : f32 to vector<8x128xf32>
    %54 = arith.maximumf %52, %53 : vector<8x128xf32>
    %55 = arith.truncf %54 : vector<8x128xf32> to vector<8x128xbf16>
    %c0_35 = arith.constant 0 : index
    %c0_36 = arith.constant 0 : index
    %56 = vector.load %arg9[%c0_35, %c0_36] : memref<128x784xbf16, #tpu.memory_space<vmem>>, vector<128x784xbf16>
    %cst_37 = arith.constant dense<0.000000e+00> : vector<8x784xf32>
    %57 = tpu.matmul %55, %56, %cst_37 {dimension_numbers = #tpu.dot_dimension_numbers<[1], [0], [0], [1], [0, 0, 1, 1], [], []>} : vector<8x128xbf16>, vector<128x784xbf16>, vector<8x784xf32> -> vector<8x784xf32>
    %c0_38 = arith.constant 0 : index
    %c896 = arith.constant 896 : index
    %58 = vector.load %arg10[%c0_38, %c896] : memref<1x1792xf32, #tpu.memory_space<vmem>>, vector<1x784xf32>
    %59 = vector.broadcast %58 : vector<1x784xf32> to vector<8x784xf32>
    %60 = arith.addf %57, %59 : vector<8x784xf32>
    %61 = math.tanh %60 : vector<8x784xf32>
    %c0_39 = arith.constant 0 : index
    %c0_40 = arith.constant 0 : index
    %62 = vector.load %arg11[%c0_39, %c0_40] : memref<8x784xf32, #tpu.memory_space<vmem>>, vector<8x784xf32>
    tpu.vector_store %arg11[%c0_39, %c0_40], %61 {strides = array<i32>} : memref<8x784xf32, #tpu.memory_space<vmem>>, vector<8x784xf32>,
    return
  }
  func.func @transform_0(%arg0: i32) -> (i32, i32) {
    %c0_i32 = arith.constant 0 : i32
    %c0_i32_0 = arith.constant 0 : i32
    return %arg0, %c0_i32 : i32, i32
  }
  func.func @transform_1(%arg0: i32) -> (i32, i32) {
    %c0_i32 = arith.constant 0 : i32
    %c0_i32_0 = arith.constant 0 : i32
    %c0_i32_1 = arith.constant 0 : i32
    return %c0_i32, %c0_i32_0 : i32, i32
  }
  func.func @transform_2(%arg0: i32) -> (i32, i32) {
    %c0_i32 = arith.constant 0 : i32
    %c0_i32_0 = arith.constant 0 : i32
    %c0_i32_1 = arith.constant 0 : i32
    return %c0_i32, %c0_i32_0 : i32, i32
  }
  func.func @transform_3(%arg0: i32) -> (i32, i32) {
    %c0_i32 = arith.constant 0 : i32
    %c0_i32_0 = arith.constant 0 : i32
    %c0_i32_1 = arith.constant 0 : i32
    return %c0_i32, %c0_i32_0 : i32, i32
  }
  func.func @transform_4(%arg0: i32) -> (i32, i32) {
    %c0_i32 = arith.constant 0 : i32
    %c0_i32_0 = arith.constant 0 : i32
    %c0_i32_1 = arith.constant 0 : i32
    return %c0_i32, %c0_i32_0 : i32, i32
  }
  func.func @transform_5(%arg0: i32) -> (i32, i32) {
    %c0_i32 = arith.constant 0 : i32
    %c0_i32_0 = arith.constant 0 : i32
    %c0_i32_1 = arith.constant 0 : i32
    return %c0_i32, %c0_i32_0 : i32, i32
  }
  func.func @transform_6(%arg0: i32) -> (i32, i32) {
    %c0_i32 = arith.constant 0 : i32
    %c0_i32_0 = arith.constant 0 : i32
    %c0_i32_1 = arith.constant 0 : i32
    return %c0_i32, %c0_i32_0 : i32, i32
  }
  func.func @transform_7(%arg0: i32) -> (i32, i32) {
    %c0_i32 = arith.constant 0 : i32
    %c0_i32_0 = arith.constant 0 : i32
    %c0_i32_1 = arith.constant 0 : i32
    return %c0_i32, %c0_i32_0 : i32, i32
  }
  func.func @transform_8(%arg0: i32) -> (i32, i32) {
    %c0_i32 = arith.constant 0 : i32
    %c0_i32_0 = arith.constant 0 : i32
    %c0_i32_1 = arith.constant 0 : i32
    return %c0_i32, %c0_i32_0 : i32, i32
  }
  func.func @transform_9(%arg0: i32) -> (i32, i32) {
    %c0_i32 = arith.constant 0 : i32
    %c0_i32_0 = arith.constant 0 : i32
    %c0_i32_1 = arith.constant 0 : i32
    return %c0_i32, %c0_i32_0 : i32, i32
  }
  func.func @transform_10(%arg0: i32) -> (i32, i32) {
    %c0_i32 = arith.constant 0 : i32
    %c0_i32_0 = arith.constant 0 : i32
    return %arg0, %c0_i32 : i32, i32
  }
}

</mosaic_0001>

<bundles_post_ra>
// kernel: custom-call
= control target key start
LH: loop header
LB: loop body
LE: loop exit
PB: predicated region body
PF: predicated region fallthrough
CT: control target
= control target key end

     0   :  { %s6_s0 = inlined_call_operand.vmem [shape: f32[1792], index: 0, kind: output, shape index: {}]  }

// kernel: autoencoder_forward.1
= control target key start
LH: loop header
LB: loop body
LE: loop exit
PB: predicated region body
PF: predicated region fallthrough
CT: control target
= control target key end

     0   :  { %v2144_v44 = vmov 0.0   ;;  %vm2145_vm0 = vmmov 0   ;;  %vm449_vm1 = vcmask 130048   ;;  %vm831_vm2 = vcmask 1045504   ;;  %s2693_s1 = inlined_call_operand.vmem [shape: bf16[784,128], index: 1, kind: input, shape index: {}]   ;;  %s2694_s0 = inlined_call_operand.vmem [shape: f32[8,784], index: 0, kind: input, shape index: {}]   ;;  %s2695_s2 = inlined_call_operand.vmem [shape: bf16[128,64], index: 2, kind: input, shape index: {}]   ;;  %s2696_s3 = inlined_call_operand.vmem [shape: bf16[64,12], index: 3, kind: input, shape index: {}]   ;;  %s2697_s9 = inlined_call_operand.vmem [shape: f32[1,1792], index: 9, kind: input, shape index: {}]   ;;  %s2698_s4 = inlined_call_operand.vmem [shape: bf16[12,3], index: 4, kind: input, shape index: {}]   ;;  %s2699_s5 = inlined_call_operand.vmem [shape: bf16[3,12], index: 5, kind: input, shape index: {}]   ;;  %s2700_s6 = inlined_call_operand.vmem [shape: bf16[12,64], index: 6, kind: input, shape index: {}]   ;;  %s2701_s7 = inlined_call_operand.vmem [shape: bf16[64,128], index: 7, kind: input, shape index: {}]   ;;  %s2702_s8 = inlined_call_operand.vmem [shape: bf16[128,784], index: 8, kind: input, shape index: {}]   ;;  %s2703_s10 = inlined_call_operand.vmem [shape: f32[8,784], index: 10, kind: output, shape index: {}]  }
   0x1   :  { %v1983_v0 = vld [vmem:[%s2693_s1 + $0x40] sm:$0xff]   ;;  %v1987_v4 = vld [vmem:[%s2693_s1 + $0x48] sm:$0xff]   ;;  %v1991_v8 = vld [vmem:[%s2693_s1 + $0x50] sm:$0xff]   ;;  %vm767_vm3 = vcmask 523264   ;;  %vm888_vm4 = vcmask 1040384   ;;  %vm889_vm5 = vcmask 1041408  }
   0x2   :  { %v1984_v1 = vld [vmem:[%s2693_s1] sm:$0xff]   ;;  %1789 = vmatprep.subr.bf16.mxu0 %v1983_v0  ;;  %v1988_v5 = vld [vmem:[%s2693_s1 + $0x8] sm:$0xff]   ;;  %v1992_v9 = vld [vmem:[%s2693_s1 + $0x10] sm:$0xff]   ;;  %vm827_vm6 = vcmask 97280   ;;  %vm884_vm7 = vcmask 23552  }
   0x3   :  { %v1985_v2 = vld [vmem:[%s2693_s1 + $0xc0] sm:$0xff]   ;;  %1790 = vmatpush3.bf16.msra.mxu0 %v1984_v1  ;;  %v1989_v6 = vld [vmem:[%s2693_s1 + $0xc8] sm:$0xff]   ;;  %v1993_v10 = vld [vmem:[%s2693_s1 + $0xd0] sm:$0xff]  }
   0x4   :  { %v1986_v3 = vld [vmem:[%s2693_s1 + $0x80] sm:$0xff]   ;;  %1811 = vmatprep.subr.bf16.mxu1 %v1985_v2  ;;  %1791 = vmatprep.subr.bf16.mxu0 %v1987_v4  ;;  %v1990_v7 = vld [vmem:[%s2693_s1 + $0x88] sm:$0xff]   ;;  %v1994_v11 = vld [vmem:[%s2693_s1 + $0x90] sm:$0xff]  }
   0x5   :  { %1812 = vmatpush3.bf16.msra.mxu1 %v1986_v3  ;;  %v1995_v12 = vld [vmem:[%s2693_s1 + $0x58] sm:$0xff]   ;;  %v1999_v16 = vld [vmem:[%s2693_s1 + $0x60] sm:$0xff]   ;;  %v2003_v20 = vld [vmem:[%s2693_s1 + $0x68] sm:$0xff]  }
   0x6   :  { %1813 = vmatprep.subr.bf16.mxu1 %v1989_v6  ;;  %v1996_v13 = vld [vmem:[%s2693_s1 + $0x18] sm:$0xff]   ;;  %v2000_v17 = vld [vmem:[%s2693_s1 + $0x20] sm:$0xff]   ;;  %v2004_v21 = vld [vmem:[%s2693_s1 + $0x28] sm:$0xff]  }
   0x7   :  { %1792 = vmatpush3.bf16.msra.mxu0 %v1988_v5  ;;  %v1997_v14 = vld [vmem:[%s2693_s1 + $0xd8] sm:$0xff]   ;;  %v2001_v18 = vld [vmem:[%s2693_s1 + $0xe0] sm:$0xff]   ;;  %v2005_v22 = vld [vmem:[%s2693_s1 + $0xe8] sm:$0xff]  }
   0x8   :  { %1793 = vmatprep.subr.bf16.mxu0 %v1991_v8  ;;  %v1998_v15 = vld [vmem:[%s2693_s1 + $0x98] sm:$0xff]   ;;  %v2002_v19 = vld [vmem:[%s2693_s1 + $0xa0] sm:$0xff]   ;;  %v2006_v23 = vld [vmem:[%s2693_s1 + $0xa8] sm:$0xff]  }
   0x9   :  { %1814 = vmatpush3.bf16.msra.mxu1 %v1990_v7  ;;  %v2007_v24 = vld [vmem:[%s2693_s1 + $0x70] sm:$0xff]   ;;  %v2011_v28 = vld [vmem:[%s2693_s1 + $0x78] sm:$0xff]   ;;  %v37_v31 = vld [vmem:[%s2694_s0 + $0x8] sm:$0xff] }
   0xa   :  { %1815 = vmatprep.subr.bf16.mxu1 %v1993_v10  ;;  %v2008_v25 = vld [vmem:[%s2693_s1 + $0x30] sm:$0xff]   ;;  %v2012_v29 = vld [vmem:[%s2693_s1 + $0x38] sm:$0xff]   ;;  %v44_v32 = vpack.c.bf16 %v37_v31, %v37_v31  ;;  %v36_v34 = vld [vmem:[%s2694_s0] sm:$0xff] }
   0xb   :  { %1794 = vmatpush3.bf16.msra.mxu0 %v1992_v9  ;;  %v2009_v26 = vld [vmem:[%s2693_s1 + $0xf0] sm:$0xff]   ;;  %v2013_v30 = vld [vmem:[%s2693_s1 + $0xf8] sm:$0xff]   ;;  %v43_v35 = vpack.c.bf16 %v36_v34, %v36_v34  ;;  %v2015_v36 = vld [vmem:[%s2693_s1 + $0x140] sm:$0xff]  }
   0xc   :  { %1795 = vmatprep.subr.bf16.mxu0 %v1995_v12  ;;  %v2010_v27 = vld [vmem:[%s2693_s1 + $0xb0] sm:$0xff]   ;;  %v2014_v33 = vld [vmem:[%s2693_s1 + $0xb8] sm:$0xff]   ;;  %485 = vmatprep.mubr.bf16.mxu0 %v44_v32  ;;  %v2016_v39 = vld [vmem:[%s2693_s1 + $0x100] sm:$0xff]  }
   0xd   :  { %1816 = vmatpush3.bf16.msra.mxu1 %v1994_v11  ;;  %v39_v37 = vld [vmem:[%s2694_s0 + $0x18] sm:$0xff]  ;;  %v38_v40 = vld [vmem:[%s2694_s0 + $0x10] sm:$0xff]  ;;  %v2017_v42 = vld [vmem:[%s2693_s1 + $0x148] sm:$0xff]  }
   0xe   :  { %1817 = vmatprep.subr.bf16.mxu1 %v1997_v14  ;;  %v46_v38 = vpack.c.bf16 %v39_v37, %v39_v37  ;;  %v45_v41 = vpack.c.bf16 %v38_v40, %v38_v40  ;;  %v2018_v43 = vld [vmem:[%s2693_s1 + $0x108] sm:$0xff]   ;;  %v2019_v45 = vld [vmem:[%s2693_s1 + $0x150] sm:$0xff]   ;;  %v2021_v47 = vld [vmem:[%s2693_s1 + $0x158] sm:$0xff]  }
   0xf   :  { %1796 = vmatpush3.bf16.msra.mxu0 %v1996_v13  ;;  %v2020_v46 = vld [vmem:[%s2693_s1 + $0x110] sm:$0xff]   ;;  %v2022_v48 = vld [vmem:[%s2693_s1 + $0x118] sm:$0xff]   ;;  %v2023_v49 = vld [vmem:[%s2693_s1 + $0x160] sm:$0xff]  }
  0x10   :  { %1797 = vmatprep.subr.bf16.mxu0 %v1999_v16  ;;  %525 = vmatprep.mubr.bf16.mxu1 %v46_v38  ;;  %v2024_v50 = vld [vmem:[%s2693_s1 + $0x120] sm:$0xff]   ;;  %v2025_v51 = vld [vmem:[%s2693_s1 + $0x168] sm:$0xff]   ;;  %v42_v55 = vld [vmem:[%s2694_s0 + $0x30] sm:$0xff] }
  0x11   :  { %1818 = vmatpush3.bf16.msra.mxu1 %v1998_v15  ;;  %v2031_v52 = vld [vmem:[%s2693_s1 + $0x180] sm:$0xff]   ;;  %v41_v53 = vld [vmem:[%s2694_s0 + $0x28] sm:$0xff]  ;;  %v49_v57 = vpack.c.bf16 %v42_v55, %v42_v55  ;;  %v2027_v58 = vld [vmem:[%s2693_s1 + $0x170] sm:$0xff]  }
  0x12   :  { %1819 = vmatprep.subr.bf16.mxu1 %v2001_v18  ;;  %v48_v54 = vpack.c.bf16 %v41_v53, %v41_v53  ;;  %v2026_v56 = vld [vmem:[%s2693_s1 + $0x128] sm:$0xff]   ;;  %v2028_v59 = vld [vmem:[%s2693_s1 + $0x130] sm:$0xff]   ;;  %v2029_v60 = vld [vmem:[%s2693_s1 + $0x178] sm:$0xff]  }
  0x13   :  { %1798 = vmatpush3.bf16.msra.mxu0 %v2000_v17  ;;  %v2030_v61 = vld [vmem:[%s2693_s1 + $0x138] sm:$0xff]   ;;  %v40_v62 = vld [vmem:[%s2694_s0 + $0x20] sm:$0xff]  ;;  %v2033_v1 = vld [vmem:[%s2695_s2 + $0x8] sm:$0xff]  }
  0x14   :  { %1799 = vmatprep.subr.bf16.mxu0 %v2003_v20  ;;  %v47_v63 = vpack.c.bf16 %v40_v62, %v40_v62  ;;  %v2032_v0 = vld [vmem:[%s2695_s2] sm:$0xff]   ;;  %v2034_v2 = vld [vmem:[%s2695_s2 + $0x10] sm:$0xff]   ;;  %v2035_v3 = vld [vmem:[%s2695_s2 + $0x18] sm:$0xff]  }
  0x15   :  { %1820 = vmatpush3.bf16.msra.mxu1 %v2002_v19  ;;  %v2036_v4 = vld [vmem:[%s2695_s2 + $0x20] sm:$0xff]   ;;  %v2037_v5 = vld [vmem:[%s2695_s2 + $0x28] sm:$0xff]   ;;  %v2038_v6 = vld [vmem:[%s2695_s2 + $0x30] sm:$0xff]  }
  0x16   :  { %1821 = vmatprep.subr.bf16.mxu1 %v2005_v22  ;;  %v2039_v7 = vld [vmem:[%s2695_s2 + $0x38] sm:$0xff]   ;;  %v2040_v8 = vld [vmem:[%s2696_s3] sm:$0xff]   ;;  %v2041_v9 = vld [vmem:[%s2696_s3 + $0x8] sm:$0xff]  }
  0x17   :  { %1800 = vmatpush3.bf16.msra.mxu0 %v2004_v21  ;;  %v1653_v11 = vld [vmem:[%s2697_s9] ss:$0 sm:$0xff]  ;;  %v2043_v37 = vld [vmem:[%s2696_s3 + $0x18] sm:$0xff]   ;;  %v1704_v40 = vld [vmem:[%s2697_s9 + $0x1] ss:$0 sm:$0xff] }
  0x18   :  { %1801 = vmatprep.subr.bf16.mxu0 %v2007_v24  ;;  %v2044_v38 = vld [vmem:[%s2698_s4] sm:$0x3f]  }
  0x19   :  { %1822 = vmatpush3.bf16.msra.mxu1 %v2006_v23  ;;  %v876_v55 = vld [vmem:[%s2699_s5] sm:$0x3]  ;;  %v1719_v62 = vld [vmem:[%s2697_s9 + $0x3] ss:$0 sm:$0xff] }
  0x1a   :  { %1823 = vmatprep.subr.bf16.mxu1 %v2009_v26 }
  0x1b   :  { %1802 = vmatpush3.bf16.msra.mxu0 %v2008_v25 }
  0x1c   :  { %1803 = vmatprep.subr.bf16.mxu0 %v2011_v28 }
  0x1d   :  { %1824 = vmatpush3.bf16.msra.mxu1 %v2010_v27 }
  0x1e   :  { %1825 = vmatprep.subr.bf16.mxu1 %v2013_v30 }
  0x1f   :  { %1804 = vmatpush3.bf16.msra.mxu0 %v2012_v29 }
  0x20   :  { %1833 = vmatprep.subr.bf16.mxu0 %v2015_v36  ;;  %v2042_v36 = vld [vmem:[%s2696_s3 + $0x10] sm:$0xff]  }
  0x21   :  { %1826 = vmatpush3.bf16.msra.mxu1 %v2014_v33 }
  0x22   :  { %486 = vmatmul.mubr.bf16.vlgmr.msra.gmra.mrb[0].mxu0 %v43_v35  ;;  %1891 = vmatprep.subr.bf16.mxu1 %v2144_v44 }
  0x23   :  { %1834 = vmatpush3.bf16.msra.mxu0 %v2016_v39  ;;  %565 = vmatprep.mubr.bf16.mxu0 %v48_v54  ;;  %v833_v39 = vsel %vm831_vm2, %v2044_v38, 0 }
  0x24   :  { %526 = vmatmul.mubr.bf16.vlgmr.msra.gmra.mrb[0].mxu1 %v45_v41  ;;  %1835 = vmatprep.subr.bf16.mxu0 %v2017_v42 }
  0x25   :  { %1893 = vmatprep.mubr.msk.bf16.mxu1 %vm2145_vm0, %v2144_v44  ;;  %1892 = vmatpush3.bf16.msra.mxu1 %v2031_v52 }
  0x26   :  { %1897 = vmatprep.subr.bf16.mxu1 %v2144_v44 }
  0x27   :  { %1836 = vmatpush3.bf16.msra.mxu0 %v2018_v43 }
  0x28   :  { %1837 = vmatprep.subr.bf16.mxu0 %v2019_v45 }
  0x2b   :  { %1838 = vmatpush3.bf16.msra.mxu0 %v2020_v46 }
  0x2c   :  { %1839 = vmatprep.subr.bf16.mxu0 %v2021_v47  ;;  %1894 = vmatmul.mubr.msk.bf16.vlgmr.msra.gmra.mrb[4].mxu1 %vm449_vm1, %v49_v57 }
  0x2d   :  { %1913 = vmatprep.mubr.msk.bf16.mxu1 %vm2145_vm0, %v2144_v44  ;;  %1898 = vmatpush3.bf16.msra.mxu1 %v2032_v0 }
  0x2e   :  { %1899 = vmatprep.subr.bf16.mxu1 %v2144_v44 }
  0x2f   :  { %1840 = vmatpush3.bf16.msra.mxu0 %v2022_v48 }
  0x30   :  { %1841 = vmatprep.subr.bf16.mxu0 %v2023_v49  ;;  %v1713_v49 = vld [vmem:[%s2697_s9 + $0x2] ss:$0 sm:$0xff] }
  0x31   :  { %1900 = vmatpush3.bf16.msra.mxu1 %v2033_v1 }
  0x32   :  { %1901 = vmatprep.subr.bf16.mxu1 %v2144_v44 }
  0x33   :  { %1842 = vmatpush3.bf16.msra.mxu0 %v2024_v50  ;;  %v2146_v50 = vmov 65535  }
  0x34   :  { %1843 = vmatprep.subr.bf16.mxu0 %v2025_v51  ;;  %v890_v51 = vsel %vm888_vm4, 4294967295, %v2146_v50  ;;  %v2079_v50 = vld [vmem:[%s2702_s8 + $0xec] ss:$28 sps:$4 sm:$0xff]  }
  0x35   :  { %1902 = vmatpush3.bf16.msra.mxu1 %v2034_v2 }
  0x36   :  { %1903 = vmatprep.subr.bf16.mxu1 %v2144_v44 }
  0x37   :  { %1844 = vmatpush3.bf16.msra.mxu0 %v2026_v56  ;;  %v891_v56 = vsel %vm889_vm5, %v890_v51, 0  ;;  %v2077_v51 = vld [vmem:[%s2702_s8 + $0xe8] ss:$28 sps:$4 sm:$0xff]  }
  0x38   :  { %1845 = vmatprep.subr.bf16.mxu0 %v2027_v58 }
  0x39   :  { %1904 = vmatpush3.bf16.msra.mxu1 %v2035_v3 }
  0x3a   :  { %1905 = vmatprep.subr.bf16.mxu1 %v2144_v44 }
  0x3b   :  { %1846 = vmatpush3.bf16.msra.mxu0 %v2028_v59 }
  0x3c   :  { %1847 = vmatprep.subr.bf16.mxu0 %v2029_v60  ;;  %v893_v60 = vand.u32 %v891_v56, %v876_v55  ;;  %v2089_v55 = vld [vmem:[%s2702_s8 + $0x158] ss:$28 sps:$4 sm:$0xff]   ;;  %v2094_v56 = vld [vmem:[%s2702_s8 + $0x18c] ss:$28 sps:$4 sm:$0xff]  }
  0x3d   :  { %1906 = vmatpush3.bf16.msra.mxu1 %v2036_v4 }
  0x3e   :  { %1907 = vmatprep.subr.bf16.mxu1 %v2144_v44 }
  0x3f   :  { %1848 = vmatpush3.bf16.msra.mxu0 %v2030_v61 }
  0x40   :  { %1917 = vmatprep.subr.bf16.mxu0 %v2144_v44 }
  0x41   :  { %1908 = vmatpush3.bf16.msra.mxu1 %v2037_v5 }
  0x42   :  { %566 = vmatmul.mubr.bf16.vlgmr.msra.gmra.mrb[4].mxu0 %v47_v63  ;;  %1909 = vmatprep.subr.bf16.mxu1 %v2144_v44  ;;  %v2045_v63 = vld [vmem:[%s2700_s6] sm:$0x3f]  }
  0x43   :  { %1925 = vmatprep.mubr.msk.bf16.mxu0 %vm2145_vm0, %v2144_v44  ;;  %1918 = vmatpush3.bf16.msra.mxu0 %v2040_v8  ;;  %v2047_v8 = vld [vmem:[%s2701_s7 + $0x8] sm:$0xff]  }
  0x44   :  { %1919 = vmatprep.subr.bf16.mxu0 %v2144_v44 }
  0x45   :  { %1910 = vmatpush3.bf16.msra.mxu1 %v2038_v6  ;;  %v955_v6 = vsel %vm831_vm2, %v2045_v63, 0 }
  0x46   :  { %1911 = vmatprep.subr.bf16.mxu1 %v2144_v44 }
  0x47   :  { %1920 = vmatpush3.bf16.msra.mxu0 %v2041_v9  ;;  %v1722_v9 = vld [vmem:[%s2697_s9 + $0x4] ss:$0 sm:$0xff] }
  0x48   :  { %1921 = vmatprep.subr.bf16.mxu0 %v2144_v44 }
  0x49   :  { %1912 = vmatpush3.bf16.msra.mxu1 %v2039_v7  ;;  %v2046_v7 = vld [vmem:[%s2701_s7] sm:$0xff]  }
  0x4a   :  { %1929 = vmatprep.subr.bf16.mxu1 %v2144_v44 }
  0x4b   :  { %1922 = vmatpush3.bf16.msra.mxu0 %v2042_v36 }
  0x4c   :  { %1923 = vmatprep.subr.bf16.mxu0 %v2144_v44 }
  0x4f   :  { %1924 = vmatpush3.bf16.msra.mxu0 %v2043_v37 }
  0x50   :  { %1947 = vmatprep.subr.bf16.mxu0 %v2144_v44 }
  0xf5   :  { %v1805_v10 = vpop.f32.mrb[0].mxu0 }
  0xf6   :  { %v1806_v12 = vpop.f32.mrb[1].mxu0 }
  0xf7   :  { %v1807_v13 = vadd.f32 %v1806_v12, %v1805_v10  ;;  %v1808_v14 = vpop.f32.mrb[2].mxu0  ;;  %v1827_v15 = vpop.f32.mrb[0].mxu1 }
  0xf8   :  { %v1809_v16 = vpop.f32.mrb[3].mxu0  ;;  %v1828_v18 = vpop.f32.mrb[1].mxu1 }
  0xf9   :  { %v488_v17 = vadd.f32 %v1807_v13, %v1653_v11  ;;  %v1829_v19 = vadd.f32 %v1828_v18, %v1827_v15  ;;  %v1830_v20 = vpop.f32.mrb[2].mxu1  ;;  %v2049_v18 = vld [vmem:[%s2701_s7 + $0x18] sm:$0xff]  }
  0xfa   :  { %v1831_v21 = vpop.f32.mrb[3].mxu1  ;;  %v2052_v20 = vld [vmem:[%s2702_s8 + $0x4] ss:$28 sps:$4 sm:$0xff]  }
  0xfb   :  { %v528_v22 = vadd.f32 %v1829_v19, %v488_v17  ;;  %v2048_v17 = vld [vmem:[%s2701_s7 + $0x10] sm:$0xff]   ;;  %v2050_v19 = vld [vmem:[%s2702_s8] ss:$28 sps:$4 sm:$0xff]   ;;  %v2055_v21 = vld [vmem:[%s2702_s8 + $0xc] ss:$28 sps:$4 sm:$0xff]  }
  0xff   :  { %v607_v23 = vpop.f32.mrb[4].mxu1 }
 0x100   :  { %v1895_v24 = vpop.f32.mrb[5].mxu1 }
 0x101   :  { %v610_v25 = vpop.f32.mrb[6].mxu1  ;;  %v2064_v24 = vld [vmem:[%s2702_s8 + $0x74] ss:$28 sps:$4 sm:$0xff]  }
 0x102   :  { %v1896_v26 = vpop.f32.mrb[7].mxu1  ;;  %v2062_v25 = vld [vmem:[%s2702_s8 + $0x70] ss:$28 sps:$4 sm:$0xff]  }
 0x103   :  { %v2070_v26 = vld [vmem:[%s2702_s8 + $0xac] ss:$28 sps:$4 sm:$0xff]  }
 0x115   :  { %v1849_v27 = vpop.f32.mrb[4].mxu0 }
 0x116   :  { %v1850_v28 = vpop.f32.mrb[5].mxu0 }
 0x117   :  { %v1851_v29 = vadd.f32 %v1850_v28, %v1849_v27  ;;  %v1852_v30 = vpop.f32.mrb[6].mxu0  ;;  %v2068_v27 = vld [vmem:[%s2702_s8 + $0xa8] ss:$28 sps:$4 sm:$0xff]  }
 0x118   :  { %v1853_v31 = vpop.f32.mrb[7].mxu0  ;;  %v2076_v28 = vld [vmem:[%s2702_s8 + $0xe4] ss:$28 sps:$4 sm:$0xff]   ;;  %v2082_v30 = vld [vmem:[%s2702_s8 + $0x11c] ss:$28 sps:$4 sm:$0xff]  }
 0x119   :  { %v568_v32 = vadd.f32 %v1851_v29, %v528_v22  ;;  %v2058_v22 = vld [vmem:[%s2702_s8 + $0x3c] ss:$28 sps:$4 sm:$0xff]  }
 0x11a   :  { %v2074_v29 = vld [vmem:[%s2702_s8 + $0xe0] ss:$28 sps:$4 sm:$0xff]   ;;  %v2080_v31 = vld [vmem:[%s2702_s8 + $0x118] ss:$28 sps:$4 sm:$0xff]  }
 0x11b   :  { %v608_v33 = vadd.f32 %v607_v23, %v568_v32  ;;  %v2056_v23 = vld [vmem:[%s2702_s8 + $0x38] ss:$28 sps:$4 sm:$0xff]  }
 0x11c   :  { %v2088_v32 = vld [vmem:[%s2702_s8 + $0x154] ss:$28 sps:$4 sm:$0xff]  }
 0x11d   :  { %v613_v34 = vmax.f32 %v608_v33, 0.0  ;;  %v2086_v33 = vld [vmem:[%s2702_s8 + $0x150] ss:$28 sps:$4 sm:$0xff]  }
 0x11f   :  { %v614_v35 = vpack.c.bf16 %v613_v34, %v613_v34  ;;  %v1724_v34 = vld [vmem:[%s2697_s9 + $0x5] ss:$0 sm:$0xff] }
 0x121   :  { %1914 = vmatmul.mubr.bf16.vlgmr.msra.gmra.mrb[8].mxu1 %v614_v35 }
 0x122   :  { %1931 = vmatprep.mubr.msk.bf16.mxu1 %vm2145_vm0, %v2144_v44  ;;  %1930 = vmatpush3.bf16.msra.mxu1 %v833_v39 }
 0x123   :  { %1935 = vmatprep.subr.bf16.mxu1 %v2144_v44 }
 0x1f4   :  { %v720_v41 = vpop.f32.mrb[8].mxu1 }
 0x1f5   :  { %v721_v42 = vadd.f32 %v1704_v40, %v720_v41  ;;  %v1915_v43 = vpop.f32.mrb[9].mxu1  ;;  %v2053_v41 = vld [vmem:[%s2702_s8 + $0x8] ss:$28 sps:$4 sm:$0xff]  }
 0x1f6   :  { %v723_v45 = vpop.f32.mrb[10].mxu1  ;;  %v2061_v43 = vld [vmem:[%s2702_s8 + $0x44] ss:$28 sps:$4 sm:$0xff]  }
 0x1f7   :  { %v726_v46 = vmax.f32 %v721_v42, 0.0  ;;  %v1916_v47 = vpop.f32.mrb[11].mxu1  ;;  %v2059_v45 = vld [vmem:[%s2702_s8 + $0x40] ss:$28 sps:$4 sm:$0xff]  }
 0x1f8   :  { %v2065_v47 = vld [vmem:[%s2702_s8 + $0x78] ss:$28 sps:$4 sm:$0xff]  }
 0x1f9   :  { %v727_v48 = vpack.c.bf16 %v726_v46, %v726_v46  ;;  %v2067_v46 = vld [vmem:[%s2702_s8 + $0x7c] ss:$28 sps:$4 sm:$0xff]  }
 0x1fb   :  { %1926 = vmatmul.mubr.msk.bf16.vlgmr.msra.gmra.mrb[8].mxu0 %vm767_vm3, %v727_v48  ;;  %v2073_v48 = vld [vmem:[%s2702_s8 + $0xb4] ss:$28 sps:$4 sm:$0xff]  }
 0x1fc   :  { %1955 = vmatprep.mubr.msk.bf16.mxu0 %vm2145_vm0, %v2144_v44  ;;  %1948 = vmatpush3.bf16.msra.mxu0 %v2046_v7 }
 0x1fd   :  { %1949 = vmatprep.subr.bf16.mxu0 %v2144_v44 }
 0x200   :  { %1950 = vmatpush3.bf16.msra.mxu0 %v2047_v8  ;;  %v2104_v8 = vld [vmem:[%s2702_s8 + $0x4c] ss:$28 sps:$4 sm:$0xff]  }
 0x201   :  { %1951 = vmatprep.subr.bf16.mxu0 %v2144_v44 }
 0x204   :  { %1952 = vmatpush3.bf16.msra.mxu0 %v2048_v17  ;;  %v2116_v17 = vld [vmem:[%s2702_s8 + $0xf4] ss:$28 sps:$4 sm:$0xff]  }
 0x205   :  { %1953 = vmatprep.subr.bf16.mxu0 %v2144_v44 }
 0x208   :  { %1954 = vmatpush3.bf16.msra.mxu0 %v2049_v18  ;;  %v2114_v18 = vld [vmem:[%s2702_s8 + $0xf0] ss:$28 sps:$4 sm:$0xff]  }
 0x209   :  { %1513 = vmatprep.subr.bf16.mxu0 %v2055_v21  ;;  %v2118_v21 = vld [vmem:[%s2702_s8 + $0x128] ss:$28 sps:$4 sm:$0xff]  }
 0x2ce   :  { %v805_v52 = vpop.f32.mrb[8].mxu0 }
 0x2cf   :  { %v806_v53 = vadd.f32 %v1713_v49, %v805_v52  ;;  %v1927_v54 = vpop.f32.mrb[9].mxu0  ;;  %v2071_v49 = vld [vmem:[%s2702_s8 + $0xb0] ss:$28 sps:$4 sm:$0xff]   ;;  %v2085_v52 = vld [vmem:[%s2702_s8 + $0x124] ss:$28 sps:$4 sm:$0xff]  }
 0x2d0   :  { %v808_v57 = vpop.f32.mrb[10].mxu0  ;;  %v2091_v54 = vld [vmem:[%s2702_s8 + $0x15c] ss:$28 sps:$4 sm:$0xff]  }
 0x2d1   :  { %v811_v58 = vmax.f32 %v806_v53, 0.0  ;;  %v1928_v59 = vpop.f32.mrb[11].mxu0  ;;  %v2083_v53 = vld [vmem:[%s2702_s8 + $0x120] ss:$28 sps:$4 sm:$0xff]   ;;  %v2097_v57 = vld [vmem:[%s2702_s8 + $0x194] ss:$28 sps:$4 sm:$0xff]  }
 0x2d2   :  { %v2095_v59 = vld [vmem:[%s2702_s8 + $0x190] ss:$28 sps:$4 sm:$0xff]  }
 0x2d3   :  { %v812_v61 = vpack.c.bf16 %v811_v58, %v811_v58  ;;  %v2092_v58 = vld [vmem:[%s2702_s8 + $0x188] ss:$28 sps:$4 sm:$0xff]  }
 0x2d5   :  { %1932 = vmatmul.mubr.msk.bf16.vlgmr.msra.gmra.mrb[12].mxu1 %vm827_vm6, %v812_v61  ;;  %v2147_v61 = vmov 0  }
 0x2d6   :  { %1936 = vmatpush3.bf16.msra.mxu1 %v893_v60  ;;  %1937 = vmatprep.mubr.msk.bf16.mxu1 %vm2145_vm0, %v2144_v44  ;;  %v2100_v60 = vld [vmem:[%s2702_s8 + $0x14] ss:$28 sps:$4 sm:$0xff]  }
 0x2d7   :  { %1941 = vmatprep.subr.bf16.mxu1 %v2144_v44 }
 0x3a8   :  { %v869_v0 = vpop.f32.mrb[12].mxu1 }
 0x3a9   :  { %v870_v1 = vadd.f32 %v1719_v62, %v869_v0  ;;  %v1933_v2 = vpop.f32.mrb[13].mxu1  ;;  %v1727_v62 = vld [vmem:[%s2697_s9 + $0x6] ss:$0 sm:$0xff] }
 0x3aa   :  { %v872_v3 = vpop.f32.mrb[14].mxu1 }
 0x3ab   :  { %v875_v4 = vpack.c.bf16 %v870_v1, %v870_v1  ;;  %v1934_v5 = vpop.f32.mrb[15].mxu1 }
 0x3ac   :  { %v2098_v5 = vld [vmem:[%s2702_s8 + $0x10] ss:$28 sps:$4 sm:$0xff]  }
 0x3ad   :  { %1938 = vmatmul.mubr.msk.bf16.vlgmr.msra.gmra.mrb[16].mxu1 %vm884_vm7, %v875_v4 }
 0x3ae   :  { %1942 = vmatpush3.bf16.msra.mxu1 %v955_v6  ;;  %1943 = vmatprep.mubr.msk.bf16.mxu1 %vm2145_vm0, %v2144_v44  ;;  %v2101_v6 = vld [vmem:[%s2702_s8 + $0x18] ss:$28 sps:$4 sm:$0xff]  }
 0x3af   :  { %1472 = vmatprep.subr.bf16.mxu1 %v2052_v20  ;;  %v2120_v20 = vld [vmem:[%s2702_s8 + $0x12c] ss:$28 sps:$4 sm:$0xff]  }
 0x480   :  { %v929_v10 = vpop.f32.mrb[16].mxu1 }
 0x481   :  { %v930_v11 = vadd.f32 %v1722_v9, %v929_v10  ;;  %v1939_v12 = vpop.f32.mrb[17].mxu1  ;;  %v2102_v9 = vld [vmem:[%s2702_s8 + $0x48] ss:$28 sps:$4 sm:$0xff]   ;;  %v2105_v10 = vld [vmem:[%s2702_s8 + $0x50] ss:$28 sps:$4 sm:$0xff]  }
 0x482   :  { %v932_v13 = vpop.f32.mrb[18].mxu1  ;;  %v2106_v12 = vld [vmem:[%s2702_s8 + $0x80] ss:$28 sps:$4 sm:$0xff]  }
 0x483   :  { %v935_v14 = vmax.f32 %v930_v11, 0.0  ;;  %v1940_v15 = vpop.f32.mrb[19].mxu1  ;;  %v2108_v11 = vld [vmem:[%s2702_s8 + $0x84] ss:$28 sps:$4 sm:$0xff]  }
 0x484   :  { %v2109_v13 = vld [vmem:[%s2702_s8 + $0x88] ss:$28 sps:$4 sm:$0xff]   ;;  %v2110_v15 = vld [vmem:[%s2702_s8 + $0xb8] ss:$28 sps:$4 sm:$0xff]  }
 0x485   :  { %v936_v16 = vpack.c.bf16 %v935_v14, %v935_v14  ;;  %v2112_v14 = vld [vmem:[%s2702_s8 + $0xbc] ss:$28 sps:$4 sm:$0xff]  }
 0x487   :  { %1944 = vmatmul.mubr.msk.bf16.vlgmr.msra.gmra.mrb[20].mxu1 %vm827_vm6, %v936_v16  ;;  %v2113_v16 = vld [vmem:[%s2702_s8 + $0xc0] ss:$28 sps:$4 sm:$0xff]  }
 0x488   :  { %1473 = vmatpush1.bf16.msra.mxu1 %v2050_v19  ;;  %1504 = vmatprep.mubr.bf16.mxu1 %v2147_v61  ;;  %v2117_v19 = vld [vmem:[%s2702_s8 + $0xf8] ss:$28 sps:$4 sm:$0xff]  }
 0x489   :  { %1474 = vmatprep.subr.bf16.mxu1 %v2058_v22  ;;  %v2121_v22 = vld [vmem:[%s2702_s8 + $0x130] ss:$28 sps:$4 sm:$0xff]  }
 0x48c   :  { %1475 = vmatpush1.bf16.msra.mxu1 %v2056_v23  ;;  %v2124_v23 = vld [vmem:[%s2702_s8 + $0x164] ss:$28 sps:$4 sm:$0xff]  }
 0x48d   :  { %1476 = vmatprep.subr.bf16.mxu1 %v2064_v24  ;;  %v2122_v24 = vld [vmem:[%s2702_s8 + $0x160] ss:$28 sps:$4 sm:$0xff]  }
 0x490   :  { %1477 = vmatpush1.bf16.msra.mxu1 %v2062_v25  ;;  %v2125_v25 = vld [vmem:[%s2702_s8 + $0x168] ss:$28 sps:$4 sm:$0xff]  }
 0x491   :  { %1478 = vmatprep.subr.bf16.mxu1 %v2070_v26  ;;  %v2128_v26 = vld [vmem:[%s2702_s8 + $0x19c] ss:$28 sps:$4 sm:$0xff]  }
 0x494   :  { %1479 = vmatpush1.bf16.msra.mxu1 %v2068_v27  ;;  %v2126_v27 = vld [vmem:[%s2702_s8 + $0x198] ss:$28 sps:$4 sm:$0xff]  }
 0x495   :  { %1480 = vmatprep.subr.bf16.mxu1 %v2076_v28  ;;  %v2129_v28 = vld [vmem:[%s2702_s8 + $0x1a0] ss:$28 sps:$4 sm:$0xff]  }
 0x498   :  { %1481 = vmatpush1.bf16.msra.mxu1 %v2074_v29  ;;  %v1149_v29 = vlaneseq }
 0x499   :  { %1482 = vmatprep.subr.bf16.mxu1 %v2082_v30 }
 0x49a   :  { %v1150_v30 = vshrl.u32 %v1149_v29, 7 }
 0x49c   :  { %1483 = vmatpush1.bf16.msra.mxu1 %v2080_v31  ;;  %v1151_v31 = vsub.s32 0, %v1150_v30 }
 0x49d   :  { %1484 = vmatprep.subr.bf16.mxu1 %v2088_v32  ;;  %v1159_v32 = vsub.s32 2, %v1150_v30 }
 0x4a0   :  { %1485 = vmatpush1.bf16.msra.mxu1 %v2086_v33  ;;  %v1147_v33 = vld [vmem:[%s2697_s9 + $0x7] sm:$0x7f] }
 0x4a1   :  { %1486 = vmatprep.subr.bf16.mxu1 %v2094_v56  ;;  %v1167_v56 = vsub.s32 4, %v1150_v30 }
 0x4a4   :  { %1487 = vmatpush1.bf16.msra.mxu1 %v2092_v58  ;;  %v1171_v58 = vsub.s32 5, %v1150_v30 }
 0x4a5   :  { %1554 = vmatprep.subr.bf16.mxu1 %v2100_v60 }
 0x55a   :  { %v991_v35 = vpop.f32.mrb[20].mxu1 }
 0x55b   :  { %v992_v36 = vadd.f32 %v1724_v34, %v991_v35  ;;  %v1945_v37 = vpop.f32.mrb[21].mxu1  ;;  %v1155_v34 = vsub.s32 1, %v1150_v30  ;;  %v1163_v35 = vsub.s32 3, %v1150_v30 }
 0x55c   :  { %v994_v38 = vpop.f32.mrb[22].mxu1  ;;  %v1160_v37 = vrot.slane %v1147_v33, %v1159_v32 }
 0x55d   :  { %v997_v39 = vmax.f32 %v992_v36, 0.0  ;;  %v1946_v40 = vpop.f32.mrb[23].mxu1  ;;  %v1152_v36 = vrot.slane %v1147_v33, %v1151_v31  ;;  %v1156_v38 = vrot.slane %v1147_v33, %v1155_v34 }
 0x55f   :  { %v998_v42 = vpack.c.bf16 %v997_v39, %v997_v39  ;;  %v1164_v39 = vrot.slane %v1147_v33, %v1163_v35 }
 0x561   :  { %1956 = vmatmul.mubr.msk.bf16.vlgmr.msra.gmra.mrb[12].mxu0 %vm767_vm3, %v998_v42 }
 0x562   :  { %1514 = vmatpush1.bf16.msra.mxu0 %v2053_v41  ;;  %1545 = vmatprep.mubr.bf16.mxu0 %v2147_v61 }
 0x563   :  { %1515 = vmatprep.subr.bf16.mxu0 %v2061_v43 }
 0x566   :  { %1516 = vmatpush1.bf16.msra.mxu0 %v2059_v45 }
 0x567   :  { %1517 = vmatprep.subr.bf16.mxu0 %v2067_v46 }
 0x56a   :  { %1518 = vmatpush1.bf16.msra.mxu0 %v2065_v47 }
 0x56b   :  { %1519 = vmatprep.subr.bf16.mxu0 %v2073_v48 }
 0x56e   :  { %1520 = vmatpush1.bf16.msra.mxu0 %v2071_v49 }
 0x56f   :  { %1521 = vmatprep.subr.bf16.mxu0 %v2079_v50 }
 0x572   :  { %1522 = vmatpush1.bf16.msra.mxu0 %v2077_v51 }
 0x573   :  { %1523 = vmatprep.subr.bf16.mxu0 %v2085_v52 }
 0x576   :  { %1524 = vmatpush1.bf16.msra.mxu0 %v2083_v53 }
 0x577   :  { %1525 = vmatprep.subr.bf16.mxu0 %v2091_v54 }
 0x57a   :  { %1526 = vmatpush1.bf16.msra.mxu0 %v2089_v55 }
 0x57b   :  { %1527 = vmatprep.subr.bf16.mxu0 %v2097_v57  ;;  %v1175_v57 = vsub.s32 6, %v1150_v30 }
 0x57d   :  { %v1176_v60 = vrot.slane %v1147_v33, %v1175_v57 }
 0x57e   :  { %1528 = vmatpush1.bf16.msra.mxu0 %v2095_v59  ;;  %v1168_v59 = vrot.slane %v1147_v33, %v1167_v56 }
 0x57f   :  { %1959 = vmatprep.subr.bf16.mxu0 %v2144_v44 }
 0x634   :  { %v1075_v63 = vpop.f32.mrb[12].mxu0 }
 0x635   :  { %v1076_v0 = vadd.f32 %v1727_v62, %v1075_v63  ;;  %v1957_v1 = vpop.f32.mrb[13].mxu0 }
 0x636   :  { %v1078_v2 = vpop.f32.mrb[14].mxu0 }
 0x637   :  { %v1081_v3 = vmax.f32 %v1076_v0, 0.0  ;;  %v1958_v4 = vpop.f32.mrb[15].mxu0 }
 0x639   :  { %v1082_v7 = vpack.c.bf16 %v1081_v3, %v1081_v3 }
 0x63b   :  { %1505 = vmatmul.mubr.bf16.vlgmr.msra.gmra.mrb[24].mxu1 %v1082_v7  ;;  %1546 = vmatmul.mubr.bf16.vlgmr.msra.gmra.mrb[16].mxu0 %v1082_v7 }
 0x63c   :  { %1555 = vmatpush1.bf16.msra.mxu1 %v2098_v5  ;;  %1960 = vmatpush3.bf16.msra.mxu0 %v2101_v6 }
 0x63d   :  { %1556 = vmatprep.subr.bf16.mxu1 %v2104_v8  ;;  %1961 = vmatprep.subr.bf16.mxu0 %v2144_v44 }
 0x63e   :  { %1586 = vmatprep.mubr.bf16.mxu1 %v2147_v61  ;;  %1975 = vmatprep.mubr.msk.bf16.mxu0 %vm2145_vm0, %v2144_v44  ;;  %v1172_v61 = vrot.slane %v1147_v33, %v1171_v58 }
 0x640   :  { %1557 = vmatpush1.bf16.msra.mxu1 %v2102_v9  ;;  %1962 = vmatpush3.bf16.msra.mxu0 %v2105_v10 }
 0x641   :  { %1558 = vmatprep.subr.bf16.mxu1 %v2108_v11  ;;  %1963 = vmatprep.subr.bf16.mxu0 %v2144_v44 }
 0x644   :  { %1559 = vmatpush1.bf16.msra.mxu1 %v2106_v12  ;;  %1964 = vmatpush3.bf16.msra.mxu0 %v2109_v13 }
 0x645   :  { %1560 = vmatprep.subr.bf16.mxu1 %v2112_v14  ;;  %1965 = vmatprep.subr.bf16.mxu0 %v2144_v44 }
 0x648   :  { %1561 = vmatpush1.bf16.msra.mxu1 %v2110_v15  ;;  %1966 = vmatpush3.bf16.msra.mxu0 %v2113_v16 }
 0x649   :  { %1562 = vmatprep.subr.bf16.mxu1 %v2116_v17  ;;  %1967 = vmatprep.subr.bf16.mxu0 %v2144_v44 }
 0x64c   :  { %1563 = vmatpush1.bf16.msra.mxu1 %v2114_v18  ;;  %1968 = vmatpush3.bf16.msra.mxu0 %v2117_v19 }
 0x64d   :  { %1564 = vmatprep.subr.bf16.mxu1 %v2120_v20  ;;  %1969 = vmatprep.subr.bf16.mxu0 %v2144_v44 }
 0x650   :  { %1565 = vmatpush1.bf16.msra.mxu1 %v2118_v21  ;;  %1970 = vmatpush3.bf16.msra.mxu0 %v2121_v22 }
 0x651   :  { %1566 = vmatprep.subr.bf16.mxu1 %v2124_v23  ;;  %1971 = vmatprep.subr.bf16.mxu0 %v2144_v44 }
 0x654   :  { %1567 = vmatpush1.bf16.msra.mxu1 %v2122_v24  ;;  %1972 = vmatpush3.bf16.msra.mxu0 %v2125_v25 }
 0x655   :  { %1568 = vmatprep.subr.bf16.mxu1 %v2128_v26  ;;  %1973 = vmatprep.subr.bf16.mxu0 %v2144_v44 }
 0x658   :  { %1569 = vmatpush1.bf16.msra.mxu1 %v2126_v27  ;;  %1974 = vmatpush3.bf16.msra.mxu0 %v2129_v28 }
 0x65b   :  { %1587 = vmatmul.mubr.bf16.vlgmr.msra.gmra.mrb[28].mxu1 %v1082_v7  ;;  %1976 = vmatmul.mubr.bf16.vlgmr.msra.gmra.mrb[20].mxu0 %v1082_v7 }
 0x70e   :  { %v1506_v40 = vpop.f32.mrb[24].mxu1  ;;  %v1547_v44 = vpop.f32.mrb[16].mxu0 }
 0x70f   :  { %v1507_v41 = vadd.f32 %v1506_v40, %v1152_v36  ;;  %v1548_v42 = vadd.f32 %v1547_v44, %v1160_v37  ;;  %v1508_v43 = vpop.f32.mrb[25].mxu1  ;;  %v1549_v45 = vpop.f32.mrb[17].mxu0 }
 0x710   :  { %v1509_v46 = vadd.f32 %v1508_v43, %v1156_v38  ;;  %v1550_v47 = vadd.f32 %v1549_v45, %v1164_v39  ;;  %v1510_v48 = vpop.f32.mrb[26].mxu1  ;;  %v1551_v49 = vpop.f32.mrb[18].mxu0 }
 0x711   :  { %2130 = vtanh.f32 %v1507_v41  ;;  %v1511_v50 = vpop.f32.mrb[27].mxu1  ;;  %v1552_v51 = vpop.f32.mrb[19].mxu0 }
 0x712   :  { %2132 = vtanh.f32 %v1548_v42 }
 0x713   :  { %2134 = vtanh.f32 %v1509_v46 }
 0x714   :  { %2136 = vtanh.f32 %v1550_v47 }
 0x71b   :  { %v2131_v52 = vpop.eup %2130 }
 0x71c   :  { %v2133_v53 = vpop.eup %2132  ;;  %1642 = vst [vmem:[%s2703_s10] sm:$0xff] %v2131_v52 }
 0x71d   :  { %v2135_v54 = vpop.eup %2134  ;;  %1644 = vst [vmem:[%s2703_s10 + $0x10] sm:$0xff] %v2133_v53 }
 0x71e   :  { %v2137_v55 = vpop.eup %2136  ;;  %1643 = vst [vmem:[%s2703_s10 + $0x8] sm:$0xff] %v2135_v54 }
 0x71f   :  { %1645 = vst [vmem:[%s2703_s10 + $0x18] sm:$0xff] %v2137_v55 }
 0x72e   :  { %v1588_v62 = vpop.f32.mrb[28].mxu1  ;;  %v1629_v63 = vpop.f32.mrb[20].mxu0 }
 0x72f   :  { %v1589_v0 = vadd.f32 %v1588_v62, %v1168_v59  ;;  %v1630_v1 = vadd.f32 %v1629_v63, %v1176_v60  ;;  %v1590_v2 = vpop.f32.mrb[29].mxu1  ;;  %v1977_v3 = vpop.f32.mrb[21].mxu0 }
 0x730   :  { %v1591_v4 = vadd.f32 %v1590_v2, %v1172_v61  ;;  %v1592_v5 = vpop.f32.mrb[30].mxu1  ;;  %v1632_v6 = vpop.f32.mrb[22].mxu0 }
 0x731   :  { %2138 = vtanh.f32 %v1589_v0  ;;  %v1593_v7 = vpop.f32.mrb[31].mxu1  ;;  %v1978_v8 = vpop.f32.mrb[23].mxu0 }
 0x732   :  { %2140 = vtanh.f32 %v1630_v1 }
 0x733   :  { %2142 = vtanh.f32 %v1591_v4 }
 0x73b   :  { %v2139_v9 = vpop.eup %2138 }
 0x73c   :  { %v2141_v10 = vpop.eup %2140  ;;  %1646 = vst [vmem:[%s2703_s10 + $0x20] sm:$0xff] %v2139_v9 }
 0x73d   :  { %v2143_v11 = vpop.eup %2142  ;;  %1648 = vst.msk [vmem:[%s2703_s10 + $0x30] sm:$0xff] %vm449_vm1, %v2141_v10 }
 0x73e   :  { %1647 = vst [vmem:[%s2703_s10 + $0x28] sm:$0xff] %v2143_v11 }

</bundles_post_ra>
